<compile_context>
chip_gen: v7x
topology: tpu7x:2x2x1
jax: 0.10.0
libtpu: 0.0.40
codegen_flags: <defaults>
</compile_context>

<pallas_src>
import jax
import jax.numpy as jnp
from jax import lax
from jax.experimental import pallas as pl
from jax.experimental.pallas import tpu as pltpu

LANE = 128
_VMEM_BUDGET = 24 * 1024 * 1024   # working-set target: safe on v5e/v6e/v7x


def _round_up(x, m):
    return (x + m - 1) // m * m


# ---------------------------------------------------------------------------
# Kernel
# ---------------------------------------------------------------------------
def qfunction_kernel(obs_ref, act_ref, w1o_ref, w1a_ref, b1_ref,
                     w2_ref, b2_ref, w3_ref, b3_ref, o_ref):
    """Fused 3-layer MLP on one (tile_b, ...) batch tile.

    Output is a lane-dense (1, tile_b) row of q-values.
    """
    cdt = w2_ref.dtype                       # matmul compute dtype (f32 or bf16)

    obs = obs_ref[...].astype(cdt)
    act = act_ref[...].astype(cdt)

    # Layer 1: split matmul replaces cat([obs, action], 1) @ W1 (no HBM concat).
    h1 = (jnp.dot(obs, w1o_ref[...], preferred_element_type=jnp.float32)
          + jnp.dot(act, w1a_ref[...], preferred_element_type=jnp.float32)
          + b1_ref[...])
    h1 = jnp.maximum(h1, 0.0)                # f32 bias + ReLU on the VPU

    # Layer 2: (tile_b, Hp) @ (Hp, Hp), f32 accumulation on the MXU.
    h2 = jnp.dot(h1.astype(cdt), w2_ref[...],
                 preferred_element_type=jnp.float32) + b2_ref[...]
    h2 = jnp.maximum(h2, 0.0)

    # Layer 3: q[b] = <h2[b, :], w3>.  Putting the (1, Hp) w3 row on the LHS and
    # contracting the hidden axis of both operands yields a lane-dense
    # (1, tile_b) result, so the store is an unmasked, lane-major row write.
    q = lax.dot_general(w3_ref[...], h2,
                        dimension_numbers=(((1,), (1,)), ((), ())),
                        preferred_element_type=jnp.float32)
    o_ref[...] = (q + b3_ref[...]).astype(o_ref.dtype)


# ---------------------------------------------------------------------------
# Parameter packing (PyTorch-style params -> kernel-ready params)
# ---------------------------------------------------------------------------
def _padded_hidden(hidden):
    # Large hiddens: align to 256 so both dims of the 256x256 MXU (v6e/v7x) are
    # fully fed.  Tiny hiddens only get lane alignment (they are overhead-bound;
    # extra padding of W2 would just be wasted MXU work).
    return _round_up(hidden, 256) if hidden >= 256 else _round_up(hidden, LANE)


def pack_params(params, obs_dim, action_dim, compute_dtype=jnp.bfloat16):
    """Split W1, pad hidden, cast matmul weights (biases / final row stay f32)."""
    w1, b1, w2, b2, w3, b3 = params
    in_dim, hidden = w1.shape
    assert in_dim == obs_dim + action_dim
    hidden_p = _padded_hidden(hidden)
    ph = hidden_p - hidden

    w1o = jnp.pad(w1[:obs_dim], ((0, 0), (0, ph))).astype(compute_dtype)
    w1a = jnp.pad(w1[obs_dim:], ((0, 0), (0, ph))).astype(compute_dtype)
    b1p = jnp.pad(b1.reshape(1, hidden), ((0, 0), (0, ph))).astype(jnp.float32)
    w2p = jnp.pad(w2, ((0, ph), (0, ph))).astype(compute_dtype)
    b2p = jnp.pad(b2.reshape(1, hidden), ((0, 0), (0, ph))).astype(jnp.float32)
    # Final layer as a (1, hidden_p) f32 row (padded entries are exactly 0).
    w3row = jnp.pad(w3.reshape(1, hidden), ((0, 0), (0, ph))).astype(jnp.float32)
    b3p = jnp.asarray(b3, jnp.float32).reshape(1, 1)
    return (w1o, w1a, b1p, w2p, b2p, w3row, b3p)


# ---------------------------------------------------------------------------
# Tile / VMEM budgeting
# ---------------------------------------------------------------------------
def _vmem_need(tile_b, hidden_p, in_dim, w_itemsize):
    stream = 2 * tile_b * (in_dim * 4 + 4)                      # dbl-buffered obs/act + out row
    weights = 2 * ((in_dim + hidden_p) * hidden_p * w_itemsize  # (conservative: 2 copies)
                   + (3 * hidden_p + 1) * 4)
    interm = 3 * tile_b * hidden_p * 4                          # h1 / h2 / temps (f32)
    return stream + weights + interm


def _choose_tile_b(B, hidden_p, in_dim, w_itemsize):
    if B <= LANE:                      # one lane-dense block covering the whole batch
        return max(B, 1)
    tile_b = 4096                      # perf-review sweep range: 2048-8192
    # Keep >= 2 grid steps so the v7x megacore can shard the batch over both TCs.
    tile_b = min(tile_b, _round_up(pl.cdiv(B, 2), LANE))
    while tile_b > LANE and _vmem_need(tile_b, hidden_p, in_dim, w_itemsize) > _VMEM_BUDGET:
        tile_b -= LANE
    return tile_b


# ---------------------------------------------------------------------------
# Forward wrapper
# ---------------------------------------------------------------------------
def qfunction_forward(obs, action, packed_params, *, tile_b=None):
    assert obs.shape[0] == action.shape[0]
    B, obs_dim = obs.shape
    action_dim = action.shape[1]
    w1o, w1a, b1, w2, b2, w3, b3 = packed_params
    weights = (w1o, w1a, b1, w2, b2, w3, b3)
    hidden_p = w2.shape[0]
    in_dim = obs_dim + action_dim
    w_itemsize = jnp.dtype(w2.dtype).itemsize

    if tile_b is None:
        tile_b = _choose_tile_b(B, hidden_p, in_dim, w_itemsize)
    # Guard tile_b so every BlockSpec satisfies the (8, 128) rule:
    # either tile_b == B (block dims == full array dims) or tile_b % 128 == 0.
    tile_b = max(1, min(tile_b, B))
    if tile_b < B:
        tile_b = _round_up(tile_b, LANE)
        if tile_b >= B:
            tile_b = B
    n_steps = pl.cdiv(B, tile_b)

    vmem_limit = max(32 * 1024 * 1024,
                     int(1.5 * _vmem_need(tile_b, hidden_p, in_dim, w_itemsize)) + (4 << 20))

    cost = pl.CostEstimate(
        flops=2 * B * (in_dim * hidden_p + hidden_p * hidden_p + hidden_p),
        transcendentals=0,
        bytes_accessed=int(B * (in_dim + 1) * 4
                           + sum(int(w.size) * jnp.dtype(w.dtype).itemsize for w in weights)))

    # TODO(synk): if the upstream producer can emit a pre-concatenated (B, in_dim)
    # array, stream a single lane-denser input instead of two narrow ones.
    stream_specs = [
        pl.BlockSpec((tile_b, obs_dim), lambda i: (i, 0)),      # streamed batch tiles
        pl.BlockSpec((tile_b, action_dim), lambda i: (i, 0)),
    ]
    resident = lambda i: (0, 0)   # constant index_map -> weight stays VMEM-resident

    def build(single_buffer_weights):
        def wspec(shape):
            if single_buffer_weights:
                # Grid-invariant weights don't need a second (double) buffer.
                return pl.BlockSpec(shape, resident, pipeline_mode=pl.Buffered(1))
            return pl.BlockSpec(shape, resident)
        return pl.pallas_call(
            qfunction_kernel,
            out_shape=jax.ShapeDtypeStruct((1, B), jnp.float32),   # lane-dense q row
            grid=(n_steps,),
            in_specs=stream_specs + [wspec(w.shape) for w in weights],
            out_specs=pl.BlockSpec((1, tile_b), lambda i: (0, i)),
            compiler_params=pltpu.CompilerParams(
                dimension_semantics=("parallel",),    # megacore-shard the batch grid
                vmem_limit_bytes=vmem_limit),
            cost_estimate=cost,
        )

    try:
        out = build(hasattr(pl, "Buffered"))(obs, action, *weights)
    except Exception:
        # pipeline_mode=pl.Buffered(1) not supported by this Pallas version;
        # fall back to default (double-buffered) resident weights.
        out = build(False)(obs, action, *weights)

    return out.reshape(B, 1)


# ---------------------------------------------------------------------------
# Init + pure-JAX reference
# ---------------------------------------------------------------------------
def init_params(key, obs_dim, action_dim, hidden_dim):
    """Deterministic synthetic init (PyTorch-like uniform fan-in scaling)."""
    in_dim = obs_dim + action_dim
    ks = jax.random.split(key, 6)

    def lin(kw, kb, fan_in, fan_out):
        bound = 1.0 / jnp.sqrt(fan_in)
        w = jax.random.uniform(kw, (fan_in, fan_out), jnp.float32, -bound, bound)
        b = jax.random.uniform(kb, (1, fan_out), jnp.float32, -bound, bound)
        return w, b

    w1, b1 = lin(ks[0], ks[1], in_dim, hidden_dim)
    w2, b2 = lin(ks[2], ks[3], hidden_dim, hidden_dim)
    w3, b3 = lin(ks[4], ks[5], hidden_dim, 1)
    return (w1, b1, w2, b2, w3, b3)


def qfunction_ref(obs, action, params):
    """Pure-JAX reference mirroring the PyTorch module."""
    w1, b1, w2, b2, w3, b3 = params
    x = jnp.concatenate([obs, action], axis=1)
    h1 = jnp.maximum(x @ w1 + b1, 0.0)
    h2 = jnp.maximum(h1 @ w2 + b2, 0.0)
    return h2 @ w3 + b3


if __name__ == "__main__":
    batch, obs_dim, action_dim, hidden_dim = 8, 16, 8, 32

    key = jax.random.PRNGKey(0)
    k_obs, k_act, k_params = jax.random.split(key, 3)
    obs = jax.random.normal(k_obs, (batch, obs_dim), jnp.float32)
    action = jax.random.normal(k_act, (batch, action_dim), jnp.float32)
    params = init_params(k_params, obs_dim, action_dim, hidden_dim)
    ref = qfunction_ref(obs, action, params)

    # f32 weights: tight check (tolerance covers the TPU MXU's default matmul precision).
    packed_f32 = pack_params(params, obs_dim, action_dim, jnp.float32)
    out = jax.block_until_ready(qfunction_forward(obs, action, packed_f32))
    assert out.shape == (batch, 1), out.shape
    assert jnp.allclose(out, ref, atol=1e-2, rtol=1e-2), "f32 mismatch vs reference"

    # Default packing: bf16 weights for the MXU, f32 accumulation + f32 epilogue.
    packed_bf16 = pack_params(params, obs_dim, action_dim)
    out_bf16 = jax.block_until_ready(qfunction_forward(obs, action, packed_bf16))
    assert out_bf16.shape == (batch, 1), out_bf16.shape
    assert jnp.allclose(out_bf16, ref, atol=5e-2, rtol=5e-2), "bf16 mismatch vs reference"

    print("KERNEL_OK")
</pallas_src>

<mosaic_0001>
module attributes {stable_mosaic.version = 11 : i64} {
  func.func @qfunction_kernel(%arg0: i32, %arg1: memref<8x16xf32, #tpu.memory_space<vmem>>, %arg2: memref<8x8xf32, #tpu.memory_space<vmem>>, %arg3: memref<16x128xf32, #tpu.memory_space<vmem>>, %arg4: memref<8x128xf32, #tpu.memory_space<vmem>>, %arg5: memref<1x128xf32, #tpu.memory_space<vmem>>, %arg6: memref<128x128xf32, #tpu.memory_space<vmem>>, %arg7: memref<1x128xf32, #tpu.memory_space<vmem>>, %arg8: memref<1x128xf32, #tpu.memory_space<vmem>>, %arg9: memref<1x1xf32, #tpu.memory_space<vmem>>, %arg10: memref<1x8xf32, #tpu.memory_space<vmem>>) attributes {dimension_semantics = [#tpu.dimension_semantics<parallel>], iteration_bounds = array<i64: 1>, scalar_prefetch = 0 : i64, scratch_operands = 0 : i64, tpu.core_type = #tpu.core_type<tc>, window_params = [{transform_indices = @transform_0, window_bounds = array<i64: 8, 16>}, {transform_indices = @transform_1, window_bounds = array<i64: 8, 8>}, {pipeline_mode = #tpu.pipeline_mode<synchronous>, transform_indices = @transform_2, window_bounds = array<i64: 16, 128>}, {pipeline_mode = #tpu.pipeline_mode<synchronous>, transform_indices = @transform_3, window_bounds = array<i64: 8, 128>}, {pipeline_mode = #tpu.pipeline_mode<synchronous>, transform_indices = @transform_4, window_bounds = array<i64: 1, 128>}, {pipeline_mode = #tpu.pipeline_mode<synchronous>, transform_indices = @transform_5, window_bounds = array<i64: 128, 128>}, {pipeline_mode = #tpu.pipeline_mode<synchronous>, transform_indices = @transform_6, window_bounds = array<i64: 1, 128>}, {pipeline_mode = #tpu.pipeline_mode<synchronous>, transform_indices = @transform_7, window_bounds = array<i64: 1, 128>}, {pipeline_mode = #tpu.pipeline_mode<synchronous>, transform_indices = @transform_8, window_bounds = array<i64: 1, 1>}, {transform_indices = @transform_9, window_bounds = array<i64: 1, 8>}]} {
    %c0 = arith.constant 0 : index
    %c0_0 = arith.constant 0 : index
    %0 = vector.load %arg1[%c0, %c0_0] : memref<8x16xf32, #tpu.memory_space<vmem>>, vector<8x16xf32>
    %c0_1 = arith.constant 0 : index
    %c0_2 = arith.constant 0 : index
    %1 = vector.load %arg2[%c0_1, %c0_2] : memref<8x8xf32, #tpu.memory_space<vmem>>, vector<8x8xf32>
    %c0_3 = arith.constant 0 : index
    %c0_4 = arith.constant 0 : index
    %2 = vector.load %arg3[%c0_3, %c0_4] : memref<16x128xf32, #tpu.memory_space<vmem>>, vector<16x128xf32>
    %cst = arith.constant dense<0.000000e+00> : vector<8x128xf32>
    %3 = tpu.matmul %0, %2, %cst {dimension_numbers = #tpu.dot_dimension_numbers<[1], [0], [0], [1], [0, 0, 1, 1], [], []>} : vector<8x16xf32>, vector<16x128xf32>, vector<8x128xf32> -> vector<8x128xf32>
    %c0_5 = arith.constant 0 : index
    %c0_6 = arith.constant 0 : index
    %4 = vector.load %arg4[%c0_5, %c0_6] : memref<8x128xf32, #tpu.memory_space<vmem>>, vector<8x128xf32>
    %cst_7 = arith.constant dense<0.000000e+00> : vector<8x128xf32>
    %5 = tpu.matmul %1, %4, %cst_7 {dimension_numbers = #tpu.dot_dimension_numbers<[1], [0], [0], [1], [0, 0, 1, 1], [], []>} : vector<8x8xf32>, vector<8x128xf32>, vector<8x128xf32> -> vector<8x128xf32>
    %6 = arith.addf %3, %5 : vector<8x128xf32>
    %c0_8 = arith.constant 0 : index
    %c0_9 = arith.constant 0 : index
    %7 = vector.load %arg5[%c0_8, %c0_9] : memref<1x128xf32, #tpu.memory_space<vmem>>, vector<1x128xf32>
    %8 = vector.broadcast %7 : vector<1x128xf32> to vector<8x128xf32>
    %9 = arith.addf %6, %8 : vector<8x128xf32>
    %cst_10 = arith.constant 0.000000e+00 : f32
    %10 = vector.broadcast %cst_10 : f32 to vector<8x128xf32>
    %11 = arith.maximumf %9, %10 : vector<8x128xf32>
    %c0_11 = arith.constant 0 : index
    %c0_12 = arith.constant 0 : index
    %12 = vector.load %arg6[%c0_11, %c0_12] : memref<128x128xf32, #tpu.memory_space<vmem>>, vector<128x128xf32>
    %cst_13 = arith.constant dense<0.000000e+00> : vector<8x128xf32>
    %13 = tpu.matmul %11, %12, %cst_13 {dimension_numbers = #tpu.dot_dimension_numbers<[1], [0], [0], [1], [0, 0, 1, 1], [], []>} : vector<8x128xf32>, vector<128x128xf32>, vector<8x128xf32> -> vector<8x128xf32>
    %c0_14 = arith.constant 0 : index
    %c0_15 = arith.constant 0 : index
    %14 = vector.load %arg7[%c0_14, %c0_15] : memref<1x128xf32, #tpu.memory_space<vmem>>, vector<1x128xf32>
    %15 = vector.broadcast %14 : vector<1x128xf32> to vector<8x128xf32>
    %16 = arith.addf %13, %15 : vector<8x128xf32>
    %cst_16 = arith.constant 0.000000e+00 : f32
    %17 = vector.broadcast %cst_16 : f32 to vector<8x128xf32>
    %18 = arith.maximumf %16, %17 : vector<8x128xf32>
    %c0_17 = arith.constant 0 : index
    %c0_18 = arith.constant 0 : index
    %19 = vector.load %arg8[%c0_17, %c0_18] : memref<1x128xf32, #tpu.memory_space<vmem>>, vector<1x128xf32>
    %cst_19 = arith.constant dense<0.000000e+00> : vector<1x8xf32>
    %20 = tpu.matmul %19, %18, %cst_19 {dimension_numbers = #tpu.dot_dimension_numbers<[1], [1], [0], [0], [0, 0, 1, 0], [], []>} : vector<1x128xf32>, vector<8x128xf32>, vector<1x8xf32> -> vector<1x8xf32>
    %c0_20 = arith.constant 0 : index
    %c0_21 = arith.constant 0 : index
    %21 = vector.load %arg9[%c0_20, %c0_21] : memref<1x1xf32, #tpu.memory_space<vmem>>, vector<1x1xf32>
    %22 = vector.broadcast %21 : vector<1x1xf32> to vector<1x8xf32>
    %23 = arith.addf %20, %22 : vector<1x8xf32>
    %c0_22 = arith.constant 0 : index
    %c0_23 = arith.constant 0 : index
    %24 = vector.load %arg10[%c0_22, %c0_23] : memref<1x8xf32, #tpu.memory_space<vmem>>, vector<1x8xf32>
    tpu.vector_store %arg10[%c0_22, %c0_23], %23 {strides = array<i32>} : memref<1x8xf32, #tpu.memory_space<vmem>>, vector<1x8xf32>,
    return
  }
  func.func @transform_0(%arg0: i32) -> (i32, i32) {
    %c0_i32 = arith.constant 0 : i32
    %c0_i32_0 = arith.constant 0 : i32
    return %arg0, %c0_i32 : i32, i32
  }
  func.func @transform_1(%arg0: i32) -> (i32, i32) {
    %c0_i32 = arith.constant 0 : i32
    %c0_i32_0 = arith.constant 0 : i32
    return %arg0, %c0_i32 : i32, i32
  }
  func.func @transform_2(%arg0: i32) -> (i32, i32) {
    %c0_i32 = arith.constant 0 : i32
    %c0_i32_0 = arith.constant 0 : i32
    %c0_i32_1 = arith.constant 0 : i32
    return %c0_i32, %c0_i32_0 : i32, i32
  }
  func.func @transform_3(%arg0: i32) -> (i32, i32) {
    %c0_i32 = arith.constant 0 : i32
    %c0_i32_0 = arith.constant 0 : i32
    %c0_i32_1 = arith.constant 0 : i32
    return %c0_i32, %c0_i32_0 : i32, i32
  }
  func.func @transform_4(%arg0: i32) -> (i32, i32) {
    %c0_i32 = arith.constant 0 : i32
    %c0_i32_0 = arith.constant 0 : i32
    %c0_i32_1 = arith.constant 0 : i32
    return %c0_i32, %c0_i32_0 : i32, i32
  }
  func.func @transform_5(%arg0: i32) -> (i32, i32) {
    %c0_i32 = arith.constant 0 : i32
    %c0_i32_0 = arith.constant 0 : i32
    %c0_i32_1 = arith.constant 0 : i32
    return %c0_i32, %c0_i32_0 : i32, i32
  }
  func.func @transform_6(%arg0: i32) -> (i32, i32) {
    %c0_i32 = arith.constant 0 : i32
    %c0_i32_0 = arith.constant 0 : i32
    %c0_i32_1 = arith.constant 0 : i32
    return %c0_i32, %c0_i32_0 : i32, i32
  }
  func.func @transform_7(%arg0: i32) -> (i32, i32) {
    %c0_i32 = arith.constant 0 : i32
    %c0_i32_0 = arith.constant 0 : i32
    %c0_i32_1 = arith.constant 0 : i32
    return %c0_i32, %c0_i32_0 : i32, i32
  }
  func.func @transform_8(%arg0: i32) -> (i32, i32) {
    %c0_i32 = arith.constant 0 : i32
    %c0_i32_0 = arith.constant 0 : i32
    %c0_i32_1 = arith.constant 0 : i32
    return %c0_i32, %c0_i32_0 : i32, i32
  }
  func.func @transform_9(%arg0: i32) -> (i32, i32) {
    %c0_i32 = arith.constant 0 : i32
    %c0_i32_0 = arith.constant 0 : i32
    return %c0_i32, %arg0 : i32, i32
  }
}

module attributes {stable_mosaic.version = 11 : i64} {
  func.func @qfunction_kernel(%arg0: i32, %arg1: memref<8x16xf32, #tpu.memory_space<vmem>>, %arg2: memref<8x8xf32, #tpu.memory_space<vmem>>, %arg3: memref<16x128xf32, #tpu.memory_space<vmem>>, %arg4: memref<8x128xf32, #tpu.memory_space<vmem>>, %arg5: memref<1x128xf32, #tpu.memory_space<vmem>>, %arg6: memref<128x128xf32, #tpu.memory_space<vmem>>, %arg7: memref<1x128xf32, #tpu.memory_space<vmem>>, %arg8: memref<1x128xf32, #tpu.memory_space<vmem>>, %arg9: memref<1x1xf32, #tpu.memory_space<vmem>>, %arg10: memref<1x8xf32, #tpu.memory_space<vmem>>) attributes {dimension_semantics = [#tpu.dimension_semantics<parallel>], iteration_bounds = array<i64: 1>, scalar_prefetch = 0 : i64, scratch_operands = 0 : i64, tpu.core_type = #tpu.core_type<tc>, window_params = [{transform_indices = @transform_0, window_bounds = array<i64: 8, 16>}, {transform_indices = @transform_1, window_bounds = array<i64: 8, 8>}, {pipeline_mode = #tpu.pipeline_mode<synchronous>, transform_indices = @transform_2, window_bounds = array<i64: 16, 128>}, {pipeline_mode = #tpu.pipeline_mode<synchronous>, transform_indices = @transform_3, window_bounds = array<i64: 8, 128>}, {pipeline_mode = #tpu.pipeline_mode<synchronous>, transform_indices = @transform_4, window_bounds = array<i64: 1, 128>}, {pipeline_mode = #tpu.pipeline_mode<synchronous>, transform_indices = @transform_5, window_bounds = array<i64: 128, 128>}, {pipeline_mode = #tpu.pipeline_mode<synchronous>, transform_indices = @transform_6, window_bounds = array<i64: 1, 128>}, {pipeline_mode = #tpu.pipeline_mode<synchronous>, transform_indices = @transform_7, window_bounds = array<i64: 1, 128>}, {pipeline_mode = #tpu.pipeline_mode<synchronous>, transform_indices = @transform_8, window_bounds = array<i64: 1, 1>}, {transform_indices = @transform_9, window_bounds = array<i64: 1, 8>}]} {
    %c0 = arith.constant 0 : index
    %c0_0 = arith.constant 0 : index
    %0 = vector.load %arg1[%c0, %c0_0] : memref<8x16xf32, #tpu.memory_space<vmem>>, vector<8x16xf32>
    %c0_1 = arith.constant 0 : index
    %c0_2 = arith.constant 0 : index
    %1 = vector.load %arg2[%c0_1, %c0_2] : memref<8x8xf32, #tpu.memory_space<vmem>>, vector<8x8xf32>
    %c0_3 = arith.constant 0 : index
    %c0_4 = arith.constant 0 : index
    %2 = vector.load %arg3[%c0_3, %c0_4] : memref<16x128xf32, #tpu.memory_space<vmem>>, vector<16x128xf32>
    %cst = arith.constant dense<0.000000e+00> : vector<8x128xf32>
    %3 = tpu.matmul %0, %2, %cst {dimension_numbers = #tpu.dot_dimension_numbers<[1], [0], [0], [1], [0, 0, 1, 1], [], []>} : vector<8x16xf32>, vector<16x128xf32>, vector<8x128xf32> -> vector<8x128xf32>
    %c0_5 = arith.constant 0 : index
    %c0_6 = arith.constant 0 : index
    %4 = vector.load %arg4[%c0_5, %c0_6] : memref<8x128xf32, #tpu.memory_space<vmem>>, vector<8x128xf32>
    %cst_7 = arith.constant dense<0.000000e+00> : vector<8x128xf32>
    %5 = tpu.matmul %1, %4, %cst_7 {dimension_numbers = #tpu.dot_dimension_numbers<[1], [0], [0], [1], [0, 0, 1, 1], [], []>} : vector<8x8xf32>, vector<8x128xf32>, vector<8x128xf32> -> vector<8x128xf32>
    %6 = arith.addf %3, %5 : vector<8x128xf32>
    %c0_8 = arith.constant 0 : index
    %c0_9 = arith.constant 0 : index
    %7 = vector.load %arg5[%c0_8, %c0_9] : memref<1x128xf32, #tpu.memory_space<vmem>>, vector<1x128xf32>
    %8 = vector.broadcast %7 : vector<1x128xf32> to vector<8x128xf32>
    %9 = arith.addf %6, %8 : vector<8x128xf32>
    %cst_10 = arith.constant 0.000000e+00 : f32
    %10 = vector.broadcast %cst_10 : f32 to vector<8x128xf32>
    %11 = arith.maximumf %9, %10 : vector<8x128xf32>
    %c0_11 = arith.constant 0 : index
    %c0_12 = arith.constant 0 : index
    %12 = vector.load %arg6[%c0_11, %c0_12] : memref<128x128xf32, #tpu.memory_space<vmem>>, vector<128x128xf32>
    %cst_13 = arith.constant dense<0.000000e+00> : vector<8x128xf32>
    %13 = tpu.matmul %11, %12, %cst_13 {dimension_numbers = #tpu.dot_dimension_numbers<[1], [0], [0], [1], [0, 0, 1, 1], [], []>} : vector<8x128xf32>, vector<128x128xf32>, vector<8x128xf32> -> vector<8x128xf32>
    %c0_14 = arith.constant 0 : index
    %c0_15 = arith.constant 0 : index
    %14 = vector.load %arg7[%c0_14, %c0_15] : memref<1x128xf32, #tpu.memory_space<vmem>>, vector<1x128xf32>
    %15 = vector.broadcast %14 : vector<1x128xf32> to vector<8x128xf32>
    %16 = arith.addf %13, %15 : vector<8x128xf32>
    %cst_16 = arith.constant 0.000000e+00 : f32
    %17 = vector.broadcast %cst_16 : f32 to vector<8x128xf32>
    %18 = arith.maximumf %16, %17 : vector<8x128xf32>
    %c0_17 = arith.constant 0 : index
    %c0_18 = arith.constant 0 : index
    %19 = vector.load %arg8[%c0_17, %c0_18] : memref<1x128xf32, #tpu.memory_space<vmem>>, vector<1x128xf32>
    %cst_19 = arith.constant dense<0.000000e+00> : vector<1x8xf32>
    %20 = tpu.matmul %19, %18, %cst_19 {dimension_numbers = #tpu.dot_dimension_numbers<[1], [1], [0], [0], [0, 0, 1, 0], [], []>} : vector<1x128xf32>, vector<8x128xf32>, vector<1x8xf32> -> vector<1x8xf32>
    %c0_20 = arith.constant 0 : index
    %c0_21 = arith.constant 0 : index
    %21 = vector.load %arg9[%c0_20, %c0_21] : memref<1x1xf32, #tpu.memory_space<vmem>>, vector<1x1xf32>
    %22 = vector.broadcast %21 : vector<1x1xf32> to vector<1x8xf32>
    %23 = arith.addf %20, %22 : vector<1x8xf32>
    %c0_22 = arith.constant 0 : index
    %c0_23 = arith.constant 0 : index
    %24 = vector.load %arg10[%c0_22, %c0_23] : memref<1x8xf32, #tpu.memory_space<vmem>>, vector<1x8xf32>
    tpu.vector_store %arg10[%c0_22, %c0_23], %23 {strides = array<i32>} : memref<1x8xf32, #tpu.memory_space<vmem>>, vector<1x8xf32>,
    return
  }
  func.func @transform_0(%arg0: i32) -> (i32, i32) {
    %c0_i32 = arith.constant 0 : i32
    %c0_i32_0 = arith.constant 0 : i32
    return %arg0, %c0_i32 : i32, i32
  }
  func.func @transform_1(%arg0: i32) -> (i32, i32) {
    %c0_i32 = arith.constant 0 : i32
    %c0_i32_0 = arith.constant 0 : i32
    return %arg0, %c0_i32 : i32, i32
  }
  func.func @transform_2(%arg0: i32) -> (i32, i32) {
    %c0_i32 = arith.constant 0 : i32
    %c0_i32_0 = arith.constant 0 : i32
    %c0_i32_1 = arith.constant 0 : i32
    return %c0_i32, %c0_i32_0 : i32, i32
  }
  func.func @transform_3(%arg0: i32) -> (i32, i32) {
    %c0_i32 = arith.constant 0 : i32
    %c0_i32_0 = arith.constant 0 : i32
    %c0_i32_1 = arith.constant 0 : i32
    return %c0_i32, %c0_i32_0 : i32, i32
  }
  func.func @transform_4(%arg0: i32) -> (i32, i32) {
    %c0_i32 = arith.constant 0 : i32
    %c0_i32_0 = arith.constant 0 : i32
    %c0_i32_1 = arith.constant 0 : i32
    return %c0_i32, %c0_i32_0 : i32, i32
  }
  func.func @transform_5(%arg0: i32) -> (i32, i32) {
    %c0_i32 = arith.constant 0 : i32
    %c0_i32_0 = arith.constant 0 : i32
    %c0_i32_1 = arith.constant 0 : i32
    return %c0_i32, %c0_i32_0 : i32, i32
  }
  func.func @transform_6(%arg0: i32) -> (i32, i32) {
    %c0_i32 = arith.constant 0 : i32
    %c0_i32_0 = arith.constant 0 : i32
    %c0_i32_1 = arith.constant 0 : i32
    return %c0_i32, %c0_i32_0 : i32, i32
  }
  func.func @transform_7(%arg0: i32) -> (i32, i32) {
    %c0_i32 = arith.constant 0 : i32
    %c0_i32_0 = arith.constant 0 : i32
    %c0_i32_1 = arith.constant 0 : i32
    return %c0_i32, %c0_i32_0 : i32, i32
  }
  func.func @transform_8(%arg0: i32) -> (i32, i32) {
    %c0_i32 = arith.constant 0 : i32
    %c0_i32_0 = arith.constant 0 : i32
    %c0_i32_1 = arith.constant 0 : i32
    return %c0_i32, %c0_i32_0 : i32, i32
  }
  func.func @transform_9(%arg0: i32) -> (i32, i32) {
    %c0_i32 = arith.constant 0 : i32
    %c0_i32_0 = arith.constant 0 : i32
    return %c0_i32, %arg0 : i32, i32
  }
}

</mosaic_0001>

<bundles_post_ra>
// kernel: tpu_custom_call.1
= control target key start
LH: loop header
LB: loop body
LE: loop exit
PB: predicated region body
PF: predicated region fallthrough
CT: control target
= control target key end

     0   :  { %s819_s0 = inlined_call_operand.hbm [shape: f32[8,16], index: 0, kind: input, shape index: {}]   ;;  %s820_s1 = inlined_call_operand.hbm [shape: f32[8,8], index: 1, kind: input, shape index: {}]   ;;  %s821_s2 = inlined_call_operand.hbm [shape: f32[16,128], index: 2, kind: input, shape index: {}]   ;;  %s822_s3 = inlined_call_operand.vmem [shape: f32[8,128], index: 3, kind: input, shape index: {}]   ;;  %s823_s4 = inlined_call_operand.vmem [shape: f32[1,128], index: 4, kind: input, shape index: {}]   ;;  %s824_s5 = inlined_call_operand.hbm [shape: f32[128,128], index: 5, kind: input, shape index: {}]   ;;  %s825_s6 = inlined_call_operand.vmem [shape: f32[1,128], index: 6, kind: input, shape index: {}]   ;;  %s826_s7 = inlined_call_operand.vmem [shape: f32[1,128], index: 7, kind: input, shape index: {}]   ;;  %s827_s8 = inlined_call_operand.<no memory space> [shape: f32[1,1], index: 8, kind: input, shape index: {}]   ;;  %s828_s9 = inlined_call_operand.hbm [shape: f32[1,8], index: 9, kind: output, shape index: {}]  }
   0x1   :  { %v14_v0 = vstv %s827_s8 }
   0x2   :  { %15 = vst [vmem:[#allocation2] sm:$0x1] %v14_v0 }
   0x3   :  { %16 = vsyncpa [#allocation4], 0 }
   0x4   :  { %17 = vsyncpa [#allocation7], 0 }
   0x5   :  { %18 = vsyncpa [#allocation10], 0 }
   0x6   :  { %19 = vsyncpa [#allocation5], 0  ;;  %s679_s11 = smov [#allocation6]   ;;  %s680_s13 = smov [#allocation3]  }
   0x7   :  { %s36_s12 = sshll.u32 %s679_s11, 4  ;;  %s26_s14 = sshll.u32 %s680_s13, 4  ;;  %s37_s12 = int_to_ptr.vmem [resolvable:$true] %s36_s12  ;;  %s27_s14 = int_to_ptr.vmem [resolvable:$true] %s26_s14 }
   0x8   :  { %s561_s17 = scalar_lea.hbm %s820_s1, 128 }
   0x9   :  { %p562_p0 = scmp.ne.s32.totalorder %s820_s1, %s561_s17  ;;  %p565_p1 = scmp.lt.u32.totalorder %s561_s17, %s820_s1 }
   0xb   :  { %p567_p2 = pnand %p565_p1, %p562_p0 }
   0xd   :  { %570 = shalt.err (!%p567_p2)
}
   0xe   :  { %s571_s21 = scalar_lea.vmem %s37_s12, 128  ;;  %p576_p4 = scmp.lt.s32.totalorder %s37_s12, %s37_s12 }
   0xf   :  { %p572_p3 = scmp.ne.s32.totalorder %s37_s12, %s571_s21  ;;  %p577_p5 = scmp.lt.s32.totalorder %s571_s21, %s571_s21 }
  0x11   :  { %p578_p6 = por %p577_p5, %p576_p4 }
  0x13   :  { %p579_p7 = pnand %p578_p6, %p572_p3 }
  0x15   :  { %582 = shalt.err (!%p579_p7)
}
  0x16   :  { %39 = dma.hbm_to_vmem [thread:$0]  %s820_s1, 128, %s37_s12, [#allocation7]  }
  0x17   :  { %s583_s26 = scalar_lea.hbm %s819_s0, 128 }
  0x18   :  { %p584_p8 = scmp.ne.s32.totalorder %s819_s0, %s583_s26  ;;  %p587_p9 = scmp.lt.u32.totalorder %s583_s26, %s819_s0 }
  0x1a   :  { %p589_p10 = pnand %p587_p9, %p584_p8 }
  0x1c   :  { %592 = shalt.err (!%p589_p10)
}
  0x1d   :  { %s593_s10 = scalar_lea.vmem %s27_s14, 128  ;;  %p598_p12 = scmp.lt.s32.totalorder %s27_s14, %s27_s14 }
  0x1e   :  { %p594_p11 = scmp.ne.s32.totalorder %s27_s14, %s593_s10  ;;  %p599_p13 = scmp.lt.s32.totalorder %s593_s10, %s593_s10 }
  0x20   :  { %p600_p0 = por %p599_p13, %p598_p12 }
  0x22   :  { %p601_p1 = pnand %p600_p0, %p594_p11 }
  0x24   :  { %604 = shalt.err (!%p601_p1)
}
  0x25   :  { %29 = dma.hbm_to_vmem [thread:$0]  %s819_s0, 128, %s27_s14, [#allocation4]  }
  0x26   :  { %s681_s12 = smov [#allocation8]   ;;  %s605_s17 = scalar_lea.hbm %s821_s2, 256 }
  0x27   :  { %s45_s13 = sshll.u32 %s681_s12, 4  ;;  %p606_p2 = scmp.ne.s32.totalorder %s821_s2, %s605_s17  ;;  %s46_s13 = int_to_ptr.vmem [resolvable:$true] %s45_s13 }
  0x28   :  { %p609_p3 = scmp.lt.u32.totalorder %s605_s17, %s821_s2 }
  0x2a   :  { %p611_p4 = pnand %p609_p3, %p606_p2 }
  0x2c   :  { %614 = shalt.err (!%p611_p4)
}
  0x2d   :  { %s615_s21 = scalar_lea.vmem %s46_s13, 256  ;;  %p620_p6 = scmp.lt.s32.totalorder %s46_s13, %s46_s13 }
  0x2e   :  { %p616_p5 = scmp.ne.s32.totalorder %s46_s13, %s615_s21  ;;  %p621_p7 = scmp.lt.s32.totalorder %s615_s21, %s615_s21 }
  0x30   :  { %p622_p8 = por %p621_p7, %p620_p6 }
  0x32   :  { %p623_p9 = pnand %p622_p8, %p616_p5 }
  0x34   :  { %626 = shalt.err (!%p623_p9)
}
  0x35   :  { %s682_s0 = smov 128   ;;  %s683_s14 = smov 8  }
  0x36   :  { %51 = dma.hbm_to_vmem [thread:$0]  %s821_s2, 256, %s46_s13, [#allocation7], %s682_s0, %s682_s0, %s683_s14  }
  0x37   :  { %s684_s24 = smov [#allocation9]   ;;  %s627_s28 = scalar_lea.hbm %s824_s5, 2048 }
  0x38   :  { %s61_s25 = sshll.u32 %s684_s24, 4  ;;  %p628_p10 = scmp.ne.s32.totalorder %s824_s5, %s627_s28  ;;  %s62_s25 = int_to_ptr.vmem [resolvable:$true] %s61_s25 }
  0x39   :  { %p631_p11 = scmp.lt.u32.totalorder %s627_s28, %s824_s5 }
  0x3b   :  { %p633_p12 = pnand %p631_p11, %p628_p10 }
  0x3d   :  { %636 = shalt.err (!%p633_p12)
}
  0x3e   :  { %s637_s11 = scalar_lea.vmem %s62_s25, 2048  ;;  %p642_p0 = scmp.lt.s32.totalorder %s62_s25, %s62_s25 }
  0x3f   :  { %p638_p13 = scmp.ne.s32.totalorder %s62_s25, %s637_s11  ;;  %p643_p1 = scmp.lt.s32.totalorder %s637_s11, %s637_s11 }
  0x41   :  { %p644_p2 = por %p643_p1, %p642_p0 }
  0x43   :  { %p645_p3 = pnand %p644_p2, %p638_p13 }
  0x45   :  { %648 = shalt.err (!%p645_p3)
}
  0x46   :  { %67 = dma.hbm_to_vmem [thread:$0]  %s824_s5, 2048, %s62_s25, [#allocation10], %s682_s0, %s682_s0, %s683_s14  }
  0x47   :  { %671 = dma.done.wait [#allocation4], 128  }
  0x48   :  { %672 = vsyncadd [#allocation4], 4294967168 }
  0x49   :  { %673 = dma.done.wait [#allocation7], 384  }
  0x4a   :  { %674 = vsyncadd [#allocation7], 4294966912 }
  0x4b   :  { %675 = dma.done.wait [#allocation10], 2048  }
  0x4c   :  { %676 = vsyncadd [#allocation10], 4294965248  ;;  %v685_v1 = vmov 0.0   ;;  %vm686_vm0 = vmmov 0   ;;  %v687_v2 = vmov 0.0|0.0   ;;  %vm91_vm1 = vcmask 64512  }
  0x4d   :  { %470 = vmatprep.subr.mxu1 %v685_v1  ;;  %472 = vmatprep.mubr.msk.f32.mxu1 %vm686_vm0, %v685_v1  ;;  %v90_v3 = vld [vmem:[%s822_s3] sm:$0xff]  ;;  %v87_v4 = vld [vmem:[#allocation6] sm:$0xff]  ;;  %v88_v5 = vld [vmem:[#allocation8] sm:$0xff]  ;;  %vm165_vm2 = vcmask 130048   ;;  %v688_v42 = vmov 0   ;;  %v349_v49 = vlaneseq  ;;  %s689_s19 = smov [#allocation11]  }
  0x4e   :  { %525 = vmatprep.subr.bf16.mxu0 %v687_v2  ;;  %514 = vmatprep.mubr.msk.f32.mxu0 %vm686_vm0, %v685_v1  ;;  %v89_v6 = vld [vmem:[#allocation8 + $0x8] sm:$0xff]  ;;  %v248_v7 = vld [vmem:[#allocation9] sm:$0xff]  ;;  %v249_v9 = vld [vmem:[#allocation9 + $0x8] sm:$0xff]  ;;  %s431_s8 = sshll.u32 %s689_s19, 4  ;;  %vm423_vm3 = vcmask 57344   ;;  %s432_s8 = int_to_ptr.vmem [resolvable:$true] %s431_s8 }
  0x4f   :  { %471 = vmatpush3.msra.mxu1 %v90_v3  ;;  %v523_v8 = vpack.c.bf16 %v89_v6, %v88_v5  ;;  %v250_v10 = vld [vmem:[#allocation9 + $0x10] sm:$0xff]  ;;  %v251_v11 = vld [vmem:[#allocation9 + $0x18] sm:$0xff]  ;;  %v526_v12 = vpack.c.bf16 %v249_v9, %v248_v7  ;;  %v86_v13 = vld [vmem:[#allocation3] sm:$0xff]  ;;  %560 = vset.pattern.permute.xlu0 %v688_v42  ;;  %v350_v50 = vshrl.u32 %v349_v49, 7  ;;  %s653_s20 = scalar_lea.vmem %s432_s8, 32  ;;  %p654_p5 = scmp.lt.s32.totalorder %s432_s8, %s432_s8 }
  0x50   :  { %473 = vmatmul.mubr.msk.f32.vlgmr.msra.gmra.mrb[0].mxu1 %vm91_vm1, %v87_v4  ;;  %522 = vmatprep.subr.bf16.mxu1 %v687_v2  ;;  %v529_v14 = vpack.c.bf16 %v251_v11, %v250_v10  ;;  %v252_v15 = vld [vmem:[#allocation9 + $0x20] sm:$0xff]  ;;  %v253_v16 = vld [vmem:[#allocation9 + $0x28] sm:$0xff]  ;;  %v254_v18 = vld [vmem:[#allocation9 + $0x30] sm:$0xff] }
  0x51   :  { %479 = vmatprep.mubr.msk.f32.mxu1 %vm686_vm0, %v685_v1  ;;  %524 = vmatpush3.bf16.msra.mxu1 %v523_v8  ;;  %v532_v17 = vpack.c.bf16 %v253_v16, %v252_v15  ;;  %v255_v19 = vld [vmem:[#allocation9 + $0x38] sm:$0xff]  ;;  %v256_v21 = vld [vmem:[#allocation9 + $0x40] sm:$0xff]  ;;  %v257_v22 = vld [vmem:[#allocation9 + $0x48] sm:$0xff]  ;;  %v351_v51 = vsub.s32 0, %v350_v50 }
  0x52   :  { %527 = vmatpush3.bf16.msra.mxu0 %v526_v12  ;;  %517 = vmatprep.subr.mxu1 %v685_v1  ;;  %v535_v20 = vpack.c.bf16 %v255_v19, %v254_v18  ;;  %v538_v23 = vpack.c.bf16 %v257_v22, %v256_v21  ;;  %v258_v24 = vld [vmem:[#allocation9 + $0x50] sm:$0xff]  ;;  %v259_v25 = vld [vmem:[#allocation9 + $0x58] sm:$0xff]  ;;  %v260_v27 = vld [vmem:[#allocation9 + $0x60] sm:$0xff] }
  0x53   :  { %528 = vmatprep.subr.bf16.mxu0 %v687_v2  ;;  %v541_v26 = vpack.c.bf16 %v259_v25, %v258_v24  ;;  %v261_v28 = vld [vmem:[#allocation9 + $0x68] sm:$0xff]  ;;  %v262_v30 = vld [vmem:[#allocation9 + $0x70] sm:$0xff]  ;;  %v263_v31 = vld [vmem:[#allocation9 + $0x78] sm:$0xff] }
  0x54   :  { %480 = vmatmul.mubr.msk.f32.vlgmr.msra.gmra.mrb[2].mxu1 %vm165_vm2, %v86_v13  ;;  %v544_v29 = vpack.c.bf16 %v261_v28, %v260_v27  ;;  %v547_v32 = vpack.c.bf16 %v263_v31, %v262_v30  ;;  %v444_v36 = vld [vmem:[%s823_s4] ss:$0 sm:$0xff] }
  0x55   :  { %519 = vmatprep.mubr.msk.f32.mxu1 %vm686_vm0, %v685_v1  ;;  %v343_v41 = vld [vmem:[#allocation2] sm:$0x1] }
  0x56   :  { %530 = vmatpush3.bf16.msra.mxu0 %v529_v14  ;;  %346 = vperm.xlu0 %560, %v343_v41   ;;  %v445_v43 = vld [vmem:[%s825_s6] ss:$0 sm:$0xff]  ;;  %s649_s6 = scalar_lea.vmem %s432_s8, 16 }
  0x57   :  { %531 = vmatprep.subr.bf16.mxu0 %v687_v2  ;;  %v342_v48 = vld [vmem:[%s826_s7] sm:$0x1]  ;;  %p650_p4 = scmp.ne.s32.totalorder %s432_s8, %s649_s6  ;;  %p655_p6 = scmp.lt.s32.totalorder %s653_s20, %s649_s6 }
  0x59   :  { %p656_p7 = por %p655_p6, %p654_p5 }
  0x5a   :  { %533 = vmatpush3.bf16.msra.mxu0 %v532_v17 }
  0x5b   :  { %534 = vmatprep.subr.bf16.mxu0 %v687_v2  ;;  %p657_p8 = pnand %p656_p7, %p650_p4 }
  0x5e   :  { %536 = vmatpush3.bf16.msra.mxu0 %v535_v20 }
  0x5f   :  { %537 = vmatprep.subr.bf16.mxu0 %v687_v2 }
  0x62   :  { %539 = vmatpush3.bf16.msra.mxu0 %v538_v23 }
  0x63   :  { %540 = vmatprep.subr.bf16.mxu0 %v687_v2 }
  0x66   :  { %542 = vmatpush3.bf16.msra.mxu0 %v541_v26 }
  0x67   :  { %543 = vmatprep.subr.bf16.mxu0 %v687_v2 }
  0x6a   :  { %545 = vmatpush3.bf16.msra.mxu0 %v544_v29 }
  0x6b   :  { %546 = vmatprep.subr.bf16.mxu0 %v687_v2 }
  0x6e   :  { %548 = vmatpush3.bf16.msra.mxu0 %v547_v32 }
  0xd5   :  { %v347_v52 = vpop.permute.xlu0 %346 }
  0xd6   :  { %v352_v53 = vrot.slane %v347_v52, %v351_v51 }
 0x123   :  { %v161_v33 = vpop.f32.mrb[0].mxu1 }
 0x124   :  { %v474_v34 = vpop.f32.mrb[1].mxu1 }
 0x127   :  { %v235_v35 = vpop.f32.mrb[2].mxu1 }
 0x128   :  { %v236_v37 = vadd.f32 %v235_v35, %v161_v33  ;;  %v481_v38 = vpop.f32.mrb[3].mxu1 }
 0x12a   :  { %v246_v39 = vadd.f32 %v444_v36, %v236_v37 }
 0x12c   :  { %v247_v40 = vmax.f32 %v246_v39, 0.0 }
 0x12e   :  { %515 = vmatmul.mubr.f32.vlgmr.msra.gmra.mrb[0].mxu0 %v247_v40 }
 0x201   :  { %v337_v44 = vpop.f32.mrb[0].mxu0 }
 0x202   :  { %v338_v45 = vadd.f32 %v445_v43, %v337_v44  ;;  %v516_v46 = vpop.f32.mrb[1].mxu0 }
 0x204   :  { %v341_v47 = vmax.f32 %v338_v45, 0.0 }
 0x206   :  { %518 = vmatpush3.xpose.msra.mxu1 %v341_v47 }
 0x209   :  { %520 = vmatmul.mubr.f32.vlgmr.msra.gmra.mrb[4].mxu1 %v342_v48 }
 0x2dc   :  { %v419_v54 = vpop.f32.mrb[4].mxu1 }
 0x2dd   :  { %v420_v55 = vadd.f32 %v419_v54, %v352_v53  ;;  %v521_v56 = vpop.f32.mrb[5].mxu1 }
 0x2df   :  { %424 = vst.msk [vmem:[#allocation11] sm:$0x1] %vm423_vm3, %v420_v55 }
 0x2e0   :  { %660 = shalt.err (!%p657_p8)
}
 0x2e1   :  { %s661_s0 = scalar_lea.hbm %s828_s9, 16 }
 0x2e2   :  { %p662_p9 = scmp.ne.s32.totalorder %s828_s9, %s661_s0  ;;  %p665_p10 = scmp.lt.u32.totalorder %s661_s0, %s828_s9 }
 0x2e4   :  { %p667_p11 = pnand %p665_p10, %p662_p9 }
 0x2e6   :  { %670 = shalt.err (!%p667_p11)
}
 0x2e7   :  { %434 = dma.vmem_to_hbm [thread:$0]  %s432_s8, 16, %s828_s9, [#allocation5]  }
 0x2e8   :  { %677 = dma.done.wait [#allocation5], 16  }
 0x2e9   :  { %678 = vsyncadd [#allocation5], 4294967280 }
 0x2ea   :  { %438 = vsyncpa [#allocation4], 1 }
 0x2eb   :  { %439 = vsyncpa [#allocation7], 1 }
 0x2ec   :  { %440 = vsyncpa [#allocation10], 1 }
 0x2ed   :  { %441 = vsyncpa [#allocation5], 1 }

// kernel: tpu_custom_call.1
= control target key start
LH: loop header
LB: loop body
LE: loop exit
PB: predicated region body
PF: predicated region fallthrough
CT: control target
= control target key end

     0   :  { %s819_s0 = inlined_call_operand.hbm [shape: f32[8,16], index: 0, kind: input, shape index: {}]   ;;  %s820_s1 = inlined_call_operand.hbm [shape: f32[8,8], index: 1, kind: input, shape index: {}]   ;;  %s821_s2 = inlined_call_operand.hbm [shape: f32[16,128], index: 2, kind: input, shape index: {}]   ;;  %s822_s3 = inlined_call_operand.vmem [shape: f32[8,128], index: 3, kind: input, shape index: {}]   ;;  %s823_s4 = inlined_call_operand.vmem [shape: f32[1,128], index: 4, kind: input, shape index: {}]   ;;  %s824_s5 = inlined_call_operand.hbm [shape: f32[128,128], index: 5, kind: input, shape index: {}]   ;;  %s825_s6 = inlined_call_operand.vmem [shape: f32[1,128], index: 6, kind: input, shape index: {}]   ;;  %s826_s7 = inlined_call_operand.vmem [shape: f32[1,128], index: 7, kind: input, shape index: {}]   ;;  %s827_s8 = inlined_call_operand.<no memory space> [shape: f32[1,1], index: 8, kind: input, shape index: {}]   ;;  %s828_s9 = inlined_call_operand.hbm [shape: f32[1,8], index: 9, kind: output, shape index: {}]  }
   0x1   :  { %v14_v0 = vstv %s827_s8 }
   0x2   :  { %15 = vst [vmem:[#allocation2] sm:$0x1] %v14_v0 }
   0x3   :  { %16 = vsyncpa [#allocation4], 0 }
   0x4   :  { %17 = vsyncpa [#allocation7], 0 }
   0x5   :  { %18 = vsyncpa [#allocation10], 0 }
   0x6   :  { %19 = vsyncpa [#allocation5], 0  ;;  %s679_s11 = smov [#allocation6]   ;;  %s680_s13 = smov [#allocation3]  }
   0x7   :  { %s36_s12 = sshll.u32 %s679_s11, 4  ;;  %s26_s14 = sshll.u32 %s680_s13, 4  ;;  %s37_s12 = int_to_ptr.vmem [resolvable:$true] %s36_s12  ;;  %s27_s14 = int_to_ptr.vmem [resolvable:$true] %s26_s14 }
   0x8   :  { %s561_s17 = scalar_lea.hbm %s820_s1, 128 }
   0x9   :  { %p562_p0 = scmp.ne.s32.totalorder %s820_s1, %s561_s17  ;;  %p565_p1 = scmp.lt.u32.totalorder %s561_s17, %s820_s1 }
   0xb   :  { %p567_p2 = pnand %p565_p1, %p562_p0 }
   0xd   :  { %570 = shalt.err (!%p567_p2)
}
   0xe   :  { %s571_s21 = scalar_lea.vmem %s37_s12, 128  ;;  %p576_p4 = scmp.lt.s32.totalorder %s37_s12, %s37_s12 }
   0xf   :  { %p572_p3 = scmp.ne.s32.totalorder %s37_s12, %s571_s21  ;;  %p577_p5 = scmp.lt.s32.totalorder %s571_s21, %s571_s21 }
  0x11   :  { %p578_p6 = por %p577_p5, %p576_p4 }
  0x13   :  { %p579_p7 = pnand %p578_p6, %p572_p3 }
  0x15   :  { %582 = shalt.err (!%p579_p7)
}
  0x16   :  { %39 = dma.hbm_to_vmem [thread:$0]  %s820_s1, 128, %s37_s12, [#allocation7]  }
  0x17   :  { %s583_s26 = scalar_lea.hbm %s819_s0, 128 }
  0x18   :  { %p584_p8 = scmp.ne.s32.totalorder %s819_s0, %s583_s26  ;;  %p587_p9 = scmp.lt.u32.totalorder %s583_s26, %s819_s0 }
  0x1a   :  { %p589_p10 = pnand %p587_p9, %p584_p8 }
  0x1c   :  { %592 = shalt.err (!%p589_p10)
}
  0x1d   :  { %s593_s10 = scalar_lea.vmem %s27_s14, 128  ;;  %p598_p12 = scmp.lt.s32.totalorder %s27_s14, %s27_s14 }
  0x1e   :  { %p594_p11 = scmp.ne.s32.totalorder %s27_s14, %s593_s10  ;;  %p599_p13 = scmp.lt.s32.totalorder %s593_s10, %s593_s10 }
  0x20   :  { %p600_p0 = por %p599_p13, %p598_p12 }
  0x22   :  { %p601_p1 = pnand %p600_p0, %p594_p11 }
  0x24   :  { %604 = shalt.err (!%p601_p1)
}
  0x25   :  { %29 = dma.hbm_to_vmem [thread:$0]  %s819_s0, 128, %s27_s14, [#allocation4]  }
  0x26   :  { %s681_s12 = smov [#allocation8]   ;;  %s605_s17 = scalar_lea.hbm %s821_s2, 256 }
  0x27   :  { %s45_s13 = sshll.u32 %s681_s12, 4  ;;  %p606_p2 = scmp.ne.s32.totalorder %s821_s2, %s605_s17  ;;  %s46_s13 = int_to_ptr.vmem [resolvable:$true] %s45_s13 }
  0x28   :  { %p609_p3 = scmp.lt.u32.totalorder %s605_s17, %s821_s2 }
  0x2a   :  { %p611_p4 = pnand %p609_p3, %p606_p2 }
  0x2c   :  { %614 = shalt.err (!%p611_p4)
}
  0x2d   :  { %s615_s21 = scalar_lea.vmem %s46_s13, 256  ;;  %p620_p6 = scmp.lt.s32.totalorder %s46_s13, %s46_s13 }
  0x2e   :  { %p616_p5 = scmp.ne.s32.totalorder %s46_s13, %s615_s21  ;;  %p621_p7 = scmp.lt.s32.totalorder %s615_s21, %s615_s21 }
  0x30   :  { %p622_p8 = por %p621_p7, %p620_p6 }
  0x32   :  { %p623_p9 = pnand %p622_p8, %p616_p5 }
  0x34   :  { %626 = shalt.err (!%p623_p9)
}
  0x35   :  { %s682_s0 = smov 128   ;;  %s683_s14 = smov 8  }
  0x36   :  { %51 = dma.hbm_to_vmem [thread:$0]  %s821_s2, 256, %s46_s13, [#allocation7], %s682_s0, %s682_s0, %s683_s14  }
  0x37   :  { %s684_s24 = smov [#allocation9]   ;;  %s627_s28 = scalar_lea.hbm %s824_s5, 2048 }
  0x38   :  { %s61_s25 = sshll.u32 %s684_s24, 4  ;;  %p628_p10 = scmp.ne.s32.totalorder %s824_s5, %s627_s28  ;;  %s62_s25 = int_to_ptr.vmem [resolvable:$true] %s61_s25 }
  0x39   :  { %p631_p11 = scmp.lt.u32.totalorder %s627_s28, %s824_s5 }
  0x3b   :  { %p633_p12 = pnand %p631_p11, %p628_p10 }
  0x3d   :  { %636 = shalt.err (!%p633_p12)
}
  0x3e   :  { %s637_s11 = scalar_lea.vmem %s62_s25, 2048  ;;  %p642_p0 = scmp.lt.s32.totalorder %s62_s25, %s62_s25 }
  0x3f   :  { %p638_p13 = scmp.ne.s32.totalorder %s62_s25, %s637_s11  ;;  %p643_p1 = scmp.lt.s32.totalorder %s637_s11, %s637_s11 }
  0x41   :  { %p644_p2 = por %p643_p1, %p642_p0 }
  0x43   :  { %p645_p3 = pnand %p644_p2, %p638_p13 }
  0x45   :  { %648 = shalt.err (!%p645_p3)
}
  0x46   :  { %67 = dma.hbm_to_vmem [thread:$0]  %s824_s5, 2048, %s62_s25, [#allocation10], %s682_s0, %s682_s0, %s683_s14  }
  0x47   :  { %671 = dma.done.wait [#allocation4], 128  }
  0x48   :  { %672 = vsyncadd [#allocation4], 4294967168 }
  0x49   :  { %673 = dma.done.wait [#allocation7], 384  }
  0x4a   :  { %674 = vsyncadd [#allocation7], 4294966912 }
  0x4b   :  { %675 = dma.done.wait [#allocation10], 2048  }
  0x4c   :  { %676 = vsyncadd [#allocation10], 4294965248  ;;  %v685_v1 = vmov 0.0   ;;  %vm686_vm0 = vmmov 0   ;;  %v687_v2 = vmov 0.0|0.0   ;;  %vm91_vm1 = vcmask 64512  }
  0x4d   :  { %470 = vmatprep.subr.mxu1 %v685_v1  ;;  %472 = vmatprep.mubr.msk.f32.mxu1 %vm686_vm0, %v685_v1  ;;  %v90_v3 = vld [vmem:[%s822_s3] sm:$0xff]  ;;  %v87_v4 = vld [vmem:[#allocation6] sm:$0xff]  ;;  %v88_v5 = vld [vmem:[#allocation8] sm:$0xff]  ;;  %vm165_vm2 = vcmask 130048   ;;  %v688_v42 = vmov 0   ;;  %v349_v49 = vlaneseq  ;;  %s689_s19 = smov [#allocation11]  }
  0x4e   :  { %525 = vmatprep.subr.bf16.mxu0 %v687_v2  ;;  %514 = vmatprep.mubr.msk.f32.mxu0 %vm686_vm0, %v685_v1  ;;  %v89_v6 = vld [vmem:[#allocation8 + $0x8] sm:$0xff]  ;;  %v248_v7 = vld [vmem:[#allocation9] sm:$0xff]  ;;  %v249_v9 = vld [vmem:[#allocation9 + $0x8] sm:$0xff]  ;;  %s431_s8 = sshll.u32 %s689_s19, 4  ;;  %vm423_vm3 = vcmask 57344   ;;  %s432_s8 = int_to_ptr.vmem [resolvable:$true] %s431_s8 }
  0x4f   :  { %471 = vmatpush3.msra.mxu1 %v90_v3  ;;  %v523_v8 = vpack.c.bf16 %v89_v6, %v88_v5  ;;  %v250_v10 = vld [vmem:[#allocation9 + $0x10] sm:$0xff]  ;;  %v251_v11 = vld [vmem:[#allocation9 + $0x18] sm:$0xff]  ;;  %v526_v12 = vpack.c.bf16 %v249_v9, %v248_v7  ;;  %v86_v13 = vld [vmem:[#allocation3] sm:$0xff]  ;;  %560 = vset.pattern.permute.xlu0 %v688_v42  ;;  %v350_v50 = vshrl.u32 %v349_v49, 7  ;;  %s653_s20 = scalar_lea.vmem %s432_s8, 32  ;;  %p654_p5 = scmp.lt.s32.totalorder %s432_s8, %s432_s8 }
  0x50   :  { %473 = vmatmul.mubr.msk.f32.vlgmr.msra.gmra.mrb[0].mxu1 %vm91_vm1, %v87_v4  ;;  %522 = vmatprep.subr.bf16.mxu1 %v687_v2  ;;  %v529_v14 = vpack.c.bf16 %v251_v11, %v250_v10  ;;  %v252_v15 = vld [vmem:[#allocation9 + $0x20] sm:$0xff]  ;;  %v253_v16 = vld [vmem:[#allocation9 + $0x28] sm:$0xff]  ;;  %v254_v18 = vld [vmem:[#allocation9 + $0x30] sm:$0xff] }
  0x51   :  { %479 = vmatprep.mubr.msk.f32.mxu1 %vm686_vm0, %v685_v1  ;;  %524 = vmatpush3.bf16.msra.mxu1 %v523_v8  ;;  %v532_v17 = vpack.c.bf16 %v253_v16, %v252_v15  ;;  %v255_v19 = vld [vmem:[#allocation9 + $0x38] sm:$0xff]  ;;  %v256_v21 = vld [vmem:[#allocation9 + $0x40] sm:$0xff]  ;;  %v257_v22 = vld [vmem:[#allocation9 + $0x48] sm:$0xff]  ;;  %v351_v51 = vsub.s32 0, %v350_v50 }
  0x52   :  { %527 = vmatpush3.bf16.msra.mxu0 %v526_v12  ;;  %517 = vmatprep.subr.mxu1 %v685_v1  ;;  %v535_v20 = vpack.c.bf16 %v255_v19, %v254_v18  ;;  %v538_v23 = vpack.c.bf16 %v257_v22, %v256_v21  ;;  %v258_v24 = vld [vmem:[#allocation9 + $0x50] sm:$0xff]  ;;  %v259_v25 = vld [vmem:[#allocation9 + $0x58] sm:$0xff]  ;;  %v260_v27 = vld [vmem:[#allocation9 + $0x60] sm:$0xff] }
  0x53   :  { %528 = vmatprep.subr.bf16.mxu0 %v687_v2  ;;  %v541_v26 = vpack.c.bf16 %v259_v25, %v258_v24  ;;  %v261_v28 = vld [vmem:[#allocation9 + $0x68] sm:$0xff]  ;;  %v262_v30 = vld [vmem:[#allocation9 + $0x70] sm:$0xff]  ;;  %v263_v31 = vld [vmem:[#allocation9 + $0x78] sm:$0xff] }
  0x54   :  { %480 = vmatmul.mubr.msk.f32.vlgmr.msra.gmra.mrb[2].mxu1 %vm165_vm2, %v86_v13  ;;  %v544_v29 = vpack.c.bf16 %v261_v28, %v260_v27  ;;  %v547_v32 = vpack.c.bf16 %v263_v31, %v262_v30  ;;  %v444_v36 = vld [vmem:[%s823_s4] ss:$0 sm:$0xff] }
  0x55   :  { %519 = vmatprep.mubr.msk.f32.mxu1 %vm686_vm0, %v685_v1  ;;  %v343_v41 = vld [vmem:[#allocation2] sm:$0x1] }
  0x56   :  { %530 = vmatpush3.bf16.msra.mxu0 %v529_v14  ;;  %346 = vperm.xlu0 %560, %v343_v41   ;;  %v445_v43 = vld [vmem:[%s825_s6] ss:$0 sm:$0xff]  ;;  %s649_s6 = scalar_lea.vmem %s432_s8, 16 }
  0x57   :  { %531 = vmatprep.subr.bf16.mxu0 %v687_v2  ;;  %v342_v48 = vld [vmem:[%s826_s7] sm:$0x1]  ;;  %p650_p4 = scmp.ne.s32.totalorder %s432_s8, %s649_s6  ;;  %p655_p6 = scmp.lt.s32.totalorder %s653_s20, %s649_s6 }
  0x59   :  { %p656_p7 = por %p655_p6, %p654_p5 }
  0x5a   :  { %533 = vmatpush3.bf16.msra.mxu0 %v532_v17 }
  0x5b   :  { %534 = vmatprep.subr.bf16.mxu0 %v687_v2  ;;  %p657_p8 = pnand %p656_p7, %p650_p4 }
  0x5e   :  { %536 = vmatpush3.bf16.msra.mxu0 %v535_v20 }
  0x5f   :  { %537 = vmatprep.subr.bf16.mxu0 %v687_v2 }
  0x62   :  { %539 = vmatpush3.bf16.msra.mxu0 %v538_v23 }
  0x63   :  { %540 = vmatprep.subr.bf16.mxu0 %v687_v2 }
  0x66   :  { %542 = vmatpush3.bf16.msra.mxu0 %v541_v26 }
  0x67   :  { %543 = vmatprep.subr.bf16.mxu0 %v687_v2 }
  0x6a   :  { %545 = vmatpush3.bf16.msra.mxu0 %v544_v29 }
  0x6b   :  { %546 = vmatprep.subr.bf16.mxu0 %v687_v2 }
  0x6e   :  { %548 = vmatpush3.bf16.msra.mxu0 %v547_v32 }
  0xd5   :  { %v347_v52 = vpop.permute.xlu0 %346 }
  0xd6   :  { %v352_v53 = vrot.slane %v347_v52, %v351_v51 }
 0x123   :  { %v161_v33 = vpop.f32.mrb[0].mxu1 }
 0x124   :  { %v474_v34 = vpop.f32.mrb[1].mxu1 }
 0x127   :  { %v235_v35 = vpop.f32.mrb[2].mxu1 }
 0x128   :  { %v236_v37 = vadd.f32 %v235_v35, %v161_v33  ;;  %v481_v38 = vpop.f32.mrb[3].mxu1 }
 0x12a   :  { %v246_v39 = vadd.f32 %v444_v36, %v236_v37 }
 0x12c   :  { %v247_v40 = vmax.f32 %v246_v39, 0.0 }
 0x12e   :  { %515 = vmatmul.mubr.f32.vlgmr.msra.gmra.mrb[0].mxu0 %v247_v40 }
 0x201   :  { %v337_v44 = vpop.f32.mrb[0].mxu0 }
 0x202   :  { %v338_v45 = vadd.f32 %v445_v43, %v337_v44  ;;  %v516_v46 = vpop.f32.mrb[1].mxu0 }
 0x204   :  { %v341_v47 = vmax.f32 %v338_v45, 0.0 }
 0x206   :  { %518 = vmatpush3.xpose.msra.mxu1 %v341_v47 }
 0x209   :  { %520 = vmatmul.mubr.f32.vlgmr.msra.gmra.mrb[4].mxu1 %v342_v48 }
 0x2dc   :  { %v419_v54 = vpop.f32.mrb[4].mxu1 }
 0x2dd   :  { %v420_v55 = vadd.f32 %v419_v54, %v352_v53  ;;  %v521_v56 = vpop.f32.mrb[5].mxu1 }
 0x2df   :  { %424 = vst.msk [vmem:[#allocation11] sm:$0x1] %vm423_vm3, %v420_v55 }
 0x2e0   :  { %660 = shalt.err (!%p657_p8)
}
 0x2e1   :  { %s661_s0 = scalar_lea.hbm %s828_s9, 16 }
 0x2e2   :  { %p662_p9 = scmp.ne.s32.totalorder %s828_s9, %s661_s0  ;;  %p665_p10 = scmp.lt.u32.totalorder %s661_s0, %s828_s9 }
 0x2e4   :  { %p667_p11 = pnand %p665_p10, %p662_p9 }
 0x2e6   :  { %670 = shalt.err (!%p667_p11)
}
 0x2e7   :  { %434 = dma.vmem_to_hbm [thread:$0]  %s432_s8, 16, %s828_s9, [#allocation5]  }
 0x2e8   :  { %677 = dma.done.wait [#allocation5], 16  }
 0x2e9   :  { %678 = vsyncadd [#allocation5], 4294967280 }
 0x2ea   :  { %438 = vsyncpa [#allocation4], 1 }
 0x2eb   :  { %439 = vsyncpa [#allocation7], 1 }
 0x2ec   :  { %440 = vsyncpa [#allocation10], 1 }
 0x2ed   :  { %441 = vsyncpa [#allocation5], 1 }

</bundles_post_ra>
